<compile_context>
chip_gen: v6e
topology: v6e:2x2x1
jax: 0.10.0
libtpu: 0.0.40
codegen_flags: <defaults>
</compile_context>

<pallas_src>
import jax
import jax.numpy as jnp
import numpy as np
from jax import lax
from jax.experimental import pallas as pl
from jax.experimental.pallas import tpu as pltpu

EPS = 1e-5
NEG_SLOPE = 0.01
VMEM_LIMIT = 32 * 1024 * 1024  # within scoped budget on v5e / v6e / v7x


# ----------------------------- kernel bodies ------------------------------ #
def _conv_rows(x_f32, wb_ref, H, WC):
    """3x3 same-conv (stride 1) on a lane-dense (TN, H, W*C) slab.

    W-direction taps live in the banded weight matrix wb (3*W*C, W*C);
    H-direction taps are gathered by concatenating 3 row-shifted views on the
    lane axis -> one K = 3*W*C MXU matmul. H zero-padding happens in VMEM.
    """
    TN = x_f32.shape[0]
    zrow = jnp.zeros((TN, 1, WC), jnp.float32)
    xp = jnp.concatenate([zrow, x_f32, zrow], axis=1)                # (TN,H+2,WC)
    patches = jnp.concatenate(
        [xp[:, 0:H, :], xp[:, 1:H + 1, :], xp[:, 2:H + 2, :]],
        axis=2)                                                      # (TN,H,3WC)
    return jnp.dot(patches.reshape(TN * H, 3 * WC), wb_ref[...],
                   preferred_element_type=jnp.float32)               # (TN*H,WC)


def _store_conv_and_stats(acc, y_ref, st_ref):
    TN, H, WC = y_ref.shape
    y_ref[...] = acc.reshape(TN, H, WC)
    st_ref[...] = jnp.concatenate(
        [jnp.sum(acc, axis=0, keepdims=True),
         jnp.sum(acc * acc, axis=0, keepdims=True)], axis=0)[None]   # (1,2,WC)


def conv_stats_kernel(x_ref, wb_ref, y_ref, st_ref):
    """conv1: raw 3x3 conv + per-tile sum / sum-of-squares (for BN1 stats)."""
    _, H, WC = y_ref.shape
    acc = _conv_rows(x_ref[...].astype(jnp.float32), wb_ref, H, WC)
    _store_conv_and_stats(acc, y_ref, st_ref)


def act_conv_stats_kernel(x_ref, wb_ref, s_ref, t_ref, y_ref, st_ref):
    """BN1 (folded scale/shift) + LeakyReLU + conv2 + BN2 partial stats."""
    _, H, WC = y_ref.shape
    a = x_ref[...].astype(jnp.float32) * s_ref[...] + t_ref[...]
    a = jnp.where(a >= 0, a, NEG_SLOPE * a)
    acc = _conv_rows(a, wb_ref, H, WC)
    _store_conv_and_stats(acc, y_ref, st_ref)


def affine_add_act_kernel(y_ref, s_ref, t_ref, id_ref, o_ref):
    """BN2 (folded scale/shift) + residual add + LeakyReLU."""
    a = (y_ref[...].astype(jnp.float32) * s_ref[...] + t_ref[...]
         + id_ref[...].astype(jnp.float32))
    o_ref[...] = jnp.where(a >= 0, a, NEG_SLOPE * a).astype(o_ref.dtype)


# ----------------------------- wrapper helpers ----------------------------- #
def _banded_weights(w, W):
    """(3, 3, Cin, Cout) conv weights -> (3*W*Cin, W*Cout) banded matrix.

    Row index = kh*W*Cin + wi*Cin + ci ; Col index = wo*Cout + co.
    Entry = w[kh, wi-wo+1, ci, co] inside the band, 0 elsewhere (the zeros
    outside the band implement the W zero-padding).
    """
    KH, KW, Cin, Cout = w.shape
    wi = jnp.arange(W)
    wo = jnp.arange(W)
    kw = wi[:, None] - wo[None, :] + 1                        # (Wi, Wo)
    valid = ((kw >= 0) & (kw < KW)).astype(w.dtype)
    kw_safe = jnp.clip(kw, 0, KW - 1)
    band = w[:, kw_safe, :, :] * valid[None, :, :, None, None]  # (KH,Wi,Wo,Ci,Co)
    band = band.transpose(0, 1, 3, 2, 4)                        # (KH,Wi,Ci,Wo,Co)
    return band.reshape(KH * W * Cin, W * Cout)


def _bn_scale_shift(stats, gamma, beta, count, W, C):
    """Fold training-mode BN into per-channel scale/shift (bias cancelled)."""
    tot = jnp.sum(stats, axis=0)                 # (2, W*C): [sum, sumsq]
    tot = tot.reshape(2, W, C).sum(axis=1)       # (2, C)
    mean = tot[0] / count
    var = tot[1] / count - mean * mean           # biased batch variance
    s = gamma.reshape(-1) * lax.rsqrt(var + EPS)
    t = beta.reshape(-1) - mean * s
    # Broadcast onto the lane-dense (w, c) lane layout.
    s_l = jnp.tile(s, W).reshape(1, 1, W * C)
    t_l = jnp.tile(t, W).reshape(1, 1, W * C)
    return s_l, t_l


def _run_conv(x2, wb, scale_shift=None):
    N, H, WC = x2.shape
    tile = pl.BlockSpec((1, H, WC), lambda i: (i, 0, 0))
    wspec = pl.BlockSpec(wb.shape, lambda i: (0, 0))
    vec = pl.BlockSpec((1, 1, WC), lambda i: (0, 0, 0))
    if scale_shift is None:
        kernel = conv_stats_kernel
        args = (x2, wb)
        in_specs = [tile, wspec]
    else:
        s_l, t_l = scale_shift
        kernel = act_conv_stats_kernel
        args = (x2, wb, s_l, t_l)
        in_specs = [tile, wspec, vec, vec]
    return pl.pallas_call(
        kernel,
        grid=(N,),
        in_specs=in_specs,
        out_specs=[pl.BlockSpec((1, H, WC), lambda i: (i, 0, 0)),
                   pl.BlockSpec((1, 2, WC), lambda i: (i, 0, 0))],
        out_shape=[jax.ShapeDtypeStruct((N, H, WC), jnp.float32),
                   jax.ShapeDtypeStruct((N, 2, WC), jnp.float32)],
        compiler_params=pltpu.CompilerParams(
            dimension_semantics=("parallel",),
            vmem_limit_bytes=VMEM_LIMIT),
    )(*args)


def _run_finalize(y2, s_l, t_l, identity2):
    N, H, WC = y2.shape
    tile = pl.BlockSpec((1, H, WC), lambda i: (i, 0, 0))
    vec = pl.BlockSpec((1, 1, WC), lambda i: (0, 0, 0))
    return pl.pallas_call(
        affine_add_act_kernel,
        grid=(N,),
        in_specs=[tile, vec, vec, tile],
        out_specs=tile,
        out_shape=jax.ShapeDtypeStruct((N, H, WC), jnp.float32),
        compiler_params=pltpu.CompilerParams(
            dimension_semantics=("parallel",),
            vmem_limit_bytes=VMEM_LIMIT),
    )(y2, s_l, t_l, identity2)


def basic_block_forward(x_nchw, params):
    """BasicBlock forward (stride=1, no downsample). x_nchw: (N, C, H, W)."""
    N, C, H, W = x_nchw.shape
    # One NCHW -> lane-dense (N, H, W*C) relayout at the block boundary.
    x2 = jnp.transpose(x_nchw, (0, 2, 3, 1)).reshape(N, H, W * C)
    wb1 = _banded_weights(params["w1"], W)
    wb2 = _banded_weights(params["w2"], W)
    count = N * H * W

    # conv biases cb1/cb2 are dropped: the BN mean subtraction cancels them.
    y1, st1 = _run_conv(x2, wb1)
    s1, t1 = _bn_scale_shift(st1, params["g1"], params["b1"], count, W, C)

    y2, st2 = _run_conv(y1, wb2, scale_shift=(s1, t1))
    s2, t2 = _bn_scale_shift(st2, params["g2"], params["b2"], count, W, C)

    out2 = _run_finalize(y2, s2, t2, x2)
    return jnp.transpose(out2.reshape(N, H, W, C), (0, 3, 1, 2))


# ---------------- pure-JAX reference (for correctness check) ---------------- #
def _ref_conv3x3(x_nchw, w_oihw, bias):
    y = lax.conv_general_dilated(
        x_nchw, w_oihw, window_strides=(1, 1), padding=((1, 1), (1, 1)),
        dimension_numbers=("NCHW", "OIHW", "NCHW"))
    return y + bias[None, :, None, None]


def _ref_bn_train(y, gamma, beta):
    mean = jnp.mean(y, axis=(0, 2, 3), keepdims=True)
    var = jnp.mean((y - mean) ** 2, axis=(0, 2, 3), keepdims=True)
    return (y - mean) * lax.rsqrt(var + EPS) * gamma[None, :, None, None] \
        + beta[None, :, None, None]


def basic_block_ref(x_nchw, params):
    w1 = jnp.transpose(params["w1"], (3, 2, 0, 1))  # HWIO -> OIHW
    w2 = jnp.transpose(params["w2"], (3, 2, 0, 1))
    out = _ref_conv3x3(x_nchw, w1, params["cb1"].reshape(-1))
    out = _ref_bn_train(out, params["g1"].reshape(-1), params["b1"].reshape(-1))
    out = jnp.where(out >= 0, out, NEG_SLOPE * out)
    out = _ref_conv3x3(out, w2, params["cb2"].reshape(-1))
    out = _ref_bn_train(out, params["g2"].reshape(-1), params["b2"].reshape(-1))
    out = out + x_nchw
    return jnp.where(out >= 0, out, NEG_SLOPE * out)


if __name__ == "__main__":
    N, C, H, W = 2, 8, 16, 16  # inplanes = planes = 8, stride = 1
    key = jax.random.PRNGKey(0)
    ks = jax.random.split(key, 8)

    params = {
        # conv weights stored as (KH, KW, Cin, Cout)
        "w1": 0.1 * jax.random.normal(ks[0], (3, 3, C, C), jnp.float32),
        "cb1": 0.05 * jax.random.normal(ks[1], (1, C), jnp.float32),
        "g1": 1.0 + 0.1 * jax.random.normal(ks[2], (1, C), jnp.float32),
        "b1": 0.1 * jax.random.normal(ks[3], (1, C), jnp.float32),
        "w2": 0.1 * jax.random.normal(ks[4], (3, 3, C, C), jnp.float32),
        "cb2": 0.05 * jax.random.normal(ks[5], (1, C), jnp.float32),
        "g2": 1.0 + 0.1 * jax.random.normal(ks[6], (1, C), jnp.float32),
        "b2": 0.1 * jax.random.normal(ks[7], (1, C), jnp.float32),
    }

    x = jax.random.normal(jax.random.PRNGKey(42), (N, C, H, W), jnp.float32)

    out = jax.block_until_ready(basic_block_forward(x, params))
    ref = jax.block_until_ready(basic_block_ref(x, params))

    assert out.shape == (N, C, H, W)
    np.testing.assert_allclose(np.asarray(out), np.asarray(ref),
                               rtol=1e-3, atol=1e-3)
    print("KERNEL_OK")
</pallas_src>

<mosaic_0001>
module attributes {stable_mosaic.version = 11 : i64} {
  func.func @conv_stats_kernel(%arg0: i32, %arg1: memref<1x16x128xf32, #tpu.memory_space<vmem>>, %arg2: memref<384x128xf32, #tpu.memory_space<vmem>>, %arg3: memref<1x16x128xf32, #tpu.memory_space<vmem>>, %arg4: memref<1x2x128xf32, #tpu.memory_space<vmem>>) attributes {dimension_semantics = [#tpu.dimension_semantics<parallel>], iteration_bounds = array<i64: 2>, scalar_prefetch = 0 : i64, scratch_operands = 0 : i64, tpu.core_type = #tpu.core_type<tc>, window_params = [{transform_indices = @transform_0, window_bounds = array<i64: 1, 16, 128>}, {pipeline_mode = #tpu.pipeline_mode<synchronous>, transform_indices = @transform_1, window_bounds = array<i64: 384, 128>}, {transform_indices = @transform_2, window_bounds = array<i64: 1, 16, 128>}, {transform_indices = @transform_3, window_bounds = array<i64: 1, 2, 128>}]} {
    %c0 = arith.constant 0 : index
    %c0_0 = arith.constant 0 : index
    %c0_1 = arith.constant 0 : index
    %0 = vector.load %arg1[%c0, %c0_0, %c0_1] : memref<1x16x128xf32, #tpu.memory_space<vmem>>, vector<1x16x128xf32>
    %cst = arith.constant 0.000000e+00 : f32
    %1 = vector.broadcast %cst : f32 to vector<1x1x128xf32>
    %2 = tpu.concatenate %1, %0, %1 in 1 : vector<1x1x128xf32>, vector<1x16x128xf32>, vector<1x1x128xf32> -> vector<1x18x128xf32>
    %3 = vector.extract_strided_slice %2 {offsets = [0, 0, 0], sizes = [1, 16, 128], strides = [1, 1, 1]} : vector<1x18x128xf32> to vector<1x16x128xf32>
    %4 = vector.extract_strided_slice %2 {offsets = [0, 1, 0], sizes = [1, 16, 128], strides = [1, 1, 1]} : vector<1x18x128xf32> to vector<1x16x128xf32>
    %5 = vector.extract_strided_slice %2 {offsets = [0, 2, 0], sizes = [1, 16, 128], strides = [1, 1, 1]} : vector<1x18x128xf32> to vector<1x16x128xf32>
    %6 = tpu.concatenate %3, %4, %5 in 2 : vector<1x16x128xf32>, vector<1x16x128xf32>, vector<1x16x128xf32> -> vector<1x16x384xf32>
    %7 = vector.shape_cast %6 : vector<1x16x384xf32> to vector<16x384xf32>
    %c0_2 = arith.constant 0 : index
    %c0_3 = arith.constant 0 : index
    %8 = vector.load %arg2[%c0_2, %c0_3] : memref<384x128xf32, #tpu.memory_space<vmem>>, vector<384x128xf32>
    %cst_4 = arith.constant dense<0.000000e+00> : vector<16x128xf32>
    %9 = tpu.matmul %7, %8, %cst_4 {dimension_numbers = #tpu.dot_dimension_numbers<[1], [0], [0], [1], [0, 0, 1, 1], [], []>} : vector<16x384xf32>, vector<384x128xf32>, vector<16x128xf32> -> vector<16x128xf32>
    %10 = vector.shape_cast %9 : vector<16x128xf32> to vector<1x16x128xf32>
    %c0_5 = arith.constant 0 : index
    %c0_6 = arith.constant 0 : index
    %c0_7 = arith.constant 0 : index
    %11 = vector.load %arg3[%c0_5, %c0_6, %c0_7] : memref<1x16x128xf32, #tpu.memory_space<vmem>>, vector<1x16x128xf32>
    tpu.vector_store %arg3[%c0_5, %c0_6, %c0_7], %10 {strides = array<i32>} : memref<1x16x128xf32, #tpu.memory_space<vmem>>, vector<1x16x128xf32>,
    %cst_8 = arith.constant dense<0.000000e+00> : vector<128xf32>
    %12 = vector.multi_reduction <add>, %9, %cst_8 [0] : vector<16x128xf32> to vector<128xf32>
    %13 = vector.shape_cast %12 : vector<128xf32> to vector<1x128xf32>
    %14 = arith.mulf %9, %9 : vector<16x128xf32>
    %cst_9 = arith.constant dense<0.000000e+00> : vector<128xf32>
    %15 = vector.multi_reduction <add>, %14, %cst_9 [0] : vector<16x128xf32> to vector<128xf32>
    %16 = vector.shape_cast %15 : vector<128xf32> to vector<1x128xf32>
    %17 = tpu.concatenate %13, %16 in 0 : vector<1x128xf32>, vector<1x128xf32> -> vector<2x128xf32>
    %18 = vector.shape_cast %17 : vector<2x128xf32> to vector<1x2x128xf32>
    %c0_10 = arith.constant 0 : index
    %c0_11 = arith.constant 0 : index
    %c0_12 = arith.constant 0 : index
    %19 = vector.load %arg4[%c0_10, %c0_11, %c0_12] : memref<1x2x128xf32, #tpu.memory_space<vmem>>, vector<1x2x128xf32>
    tpu.vector_store %arg4[%c0_10, %c0_11, %c0_12], %18 {strides = array<i32>} : memref<1x2x128xf32, #tpu.memory_space<vmem>>, vector<1x2x128xf32>,
    return
  }
  func.func @transform_0(%arg0: i32) -> (i32, i32, i32) {
    %c0_i32 = arith.constant 0 : i32
    %c0_i32_0 = arith.constant 0 : i32
    %c0_i32_1 = arith.constant 0 : i32
    return %arg0, %c0_i32, %c0_i32_0 : i32, i32, i32
  }
  func.func @transform_1(%arg0: i32) -> (i32, i32) {
    %c0_i32 = arith.constant 0 : i32
    %c0_i32_0 = arith.constant 0 : i32
    %c0_i32_1 = arith.constant 0 : i32
    return %c0_i32, %c0_i32_0 : i32, i32
  }
  func.func @transform_2(%arg0: i32) -> (i32, i32, i32) {
    %c0_i32 = arith.constant 0 : i32
    %c0_i32_0 = arith.constant 0 : i32
    %c0_i32_1 = arith.constant 0 : i32
    return %arg0, %c0_i32, %c0_i32_0 : i32, i32, i32
  }
  func.func @transform_3(%arg0: i32) -> (i32, i32, i32) {
    %c0_i32 = arith.constant 0 : i32
    %c0_i32_0 = arith.constant 0 : i32
    %c0_i32_1 = arith.constant 0 : i32
    return %arg0, %c0_i32, %c0_i32_0 : i32, i32, i32
  }
}

</mosaic_0001>

<bundles_post_ra>
// kernel: tpu_custom_call.1
= control target key start
LH: loop header
LB: loop body
LE: loop exit
PB: predicated region body
PF: predicated region fallthrough
CT: control target
= control target key end

     0   :  { %9 = vsyncpa [#allocation3], 0  ;;  %s1200_s0 = inlined_call_operand.hbm [shape: f32[2,16,128], index: 0, kind: input, shape index: {}]   ;;  %s1201_s1 = inlined_call_operand.hbm [shape: f32[384,128], index: 1, kind: input, shape index: {}]   ;;  %s1202_s2 = inlined_call_operand.hbm [shape: f32[2,16,128], index: 2, kind: output, shape index: {0}]   ;;  %s1203_s3 = inlined_call_operand.hbm [shape: f32[2,2,128], index: 3, kind: output, shape index: {1}]  }
   0x1   :  { %11 = vsyncpa [#allocation3 + $0x1], 0 }
   0x2   :  { %12 = vsyncpa [#allocation6], 0 }
   0x3   :  { %13 = vsyncpa [#allocation4], 0 }
   0x4   :  { %15 = vsyncpa [#allocation4 + $0x1], 0 }
   0x5   :  { %16 = vsyncpa [#allocation9], 0 }
   0x6   :  { %18 = vsyncpa [#allocation9 + $0x1], 0  ;;  %s973_s12 = smov 0   ;;  %s975_s13 = smov 0  }
   0x7   :  { %s977_s14 = smov 0   ;;  %s979_s15 = smov 0  }
   0x8 LB: > { %s994_s16 = sadd.s32 4294967295, %s943_s15   ;;  %s611_s17 = sadd.s32 4294967294, %s943_s15   ;;  %s943_s15 = sphi %s979_s15, %s1225_s15   ;;  %s939_s14 = sphi %s977_s14, %s1224_s14   ;;  %s935_s13 = sphi %s975_s13, %s1223_s13   ;;  %s931_s12 = sphi %s973_s12, %s1222_s12  }
   0x9   : > { %p44_p0 = scmp.ne.s32.totalorder %s935_s13, %s931_s12  ;;  %p1204_p1 = scmp.eq.s32.totalorder %s994_s16, 0 }
   0xa   : > { %p95_p3 = scmp.eq.s32.totalorder %s611_s17, 1  ;;  %p612_p5 = scmp.ge.s32.totalorder %s943_s15, 1 }
   0xb   : > { %p1003_p4 = por %p1204_p1, %p44_p0  ;;  %p128_p7 = scmp.lt.s32.totalorder %s943_s15, 3 }
   0xc   : > { %p1008_p6 = por %p95_p3, %p44_p0  ;;  %s945_s21 = smov [#allocation5]  }
   0xd   : > { %s1208_s18 = scalar_select %p1003_p4, 1, 0 }
   0xe   : > { %s1209_s19 = scalar_select %p1008_p6, 1, 0 }
   0xf   : > { %p1013_p8 = pnand %p612_p5, %p128_p7  ;;  %s140_s22 = sshll.u32 %s945_s21, 4  ;;  %s141_s22 = int_to_ptr.vmem [resolvable:$true] %s140_s22 }
  0x10   : > { %s1027_s24 = sadd.s32 1, %s943_s15   ;;  %s31_s25 = sadd.s32 1, %s939_s14 }
  0x11   : > { %s1210_s20 = scalar_select %p1013_p8, 1, 0 }
  0x12   : > { %p735_p9 = pneg %p1013_p8  ;;  %s28_s26 = ssub.s32 %s943_s15, %s1027_s24 }
  0x13   : > { %s802_s27 = scalar_lea.vmem %s141_s22, 6144  ;;  %p810_p5 = scmp.lt.s32.totalorder %s141_s22, %s141_s22 }
  0x14   : > { %p1022_p11 = pnand %p735_p9, %p1204_p1  ;;  %p803_p13 = scmp.ne.s32.totalorder %s141_s22, %s802_s27 }
  0x15   : > { %p811_p7 = scmp.lt.s32.totalorder %s802_s27, %s802_s27 }
  0x16   : > { %p793_p12 = pneg %p1022_p11 }
  0x17   : > { %p812_p10 = por %p811_p7, %p810_p5 }
  0x18   : > { %p805_p0 = pnand %p803_p13, %p793_p12 }
  0x1a   : > { %p806_p3 = pneg %p805_p0 }
  0x1c   : > { %p813_p2 = pnand %p812_p10, %p806_p3 }
  0x1e   : > { %816 = shalt.err (!%p813_p2)
}
  0x1f   : > { %s946_s28 = smov 128   ;;  %s947_s29 = smov 8  }
  0x20   : > { %738 = dma.hbm_to_vmem [thread:$0]  (!%p1022_p11), %s1201_s1, 6144, %s141_s22, [#allocation6], %s946_s28, %s946_s28, %s947_s29  }
  0x21   : > { %p29_p2 = scmp.eq.s32.totalorder %s28_s26, 0  ;;  %p38_p9 = scmp.ne.s32.totalorder %s939_s14, %s935_s13 }
  0x22   : > { %p39_p10 = scmp.eq.s32.totalorder %s943_s15, 0  ;;  %p751_p12 = scmp.lt.s32.totalorder %s943_s15, 2 }
  0x23   : > { %s1047_s5 = scalar_select %p29_p2, %s939_s14, %s31_s25  }
  0x24   : > { %p40_p13 = por %p39_p10, %p38_p9  ;;  %p1212_p0 = scmp.eq.s32.totalorder %s994_s16, 1 }
  0x25   : > { %s154_s7 = sand.u32 1, %s939_s14   ;;  %s632_s8 = sshll.u32 %s943_s15, 8 }
  0x26   : > { %p1051_p3 = por %p1212_p0, %p38_p9  ;;  %s615_s9 = sshll.u32 %s154_s7, 4 }
  0x27   : > { %s1060_s17 = scalar_lea.hbm %s1200_s0, %s632_s8  ;;  %s158_s21 = scalar_lea.vmem [#allocation2], %s615_s9 }
  0x28   : > { %s1213_s6 = scalar_select %p1051_p3, 1, 0 }
  0x29   : > { %s165_s22 = sshll.u32 %s158_s21, 4  ;;  %p1062_p11 = pnand %p751_p12, %p40_p13  ;;  %s1066_s22 = int_to_ptr.vmem [resolvable:$true] %s165_s22 }
  0x2a   : > { %s1068_s25 = scalar_lea.sflag [#allocation3], %s154_s7  ;;  %s817_s26 = scalar_lea.hbm %s1060_s17, 256 }
  0x2b   : > { %p818_p5 = scmp.ne.s32.totalorder %s1060_s17, %s817_s26  ;;  %p819_p7 = pneg %p1062_p11 }
  0x2c   : > { %s822_s4 = scalar_lea.hbm %s1200_s0, 512  ;;  %p823_p10 = scmp.lt.s32.totalorder %s1060_s17, %s1200_s0 }
  0x2d   : > { %p820_p2 = pnand %p819_p7, %p818_p5  ;;  %p824_p12 = scmp.lt.s32.totalorder %s822_s4, %s817_s26 }
  0x2f   : > { %p821_p9 = pneg %p820_p2  ;;  %p825_p13 = por %p824_p12, %p823_p10 }
  0x31   : > { %p826_p0 = pnand %p825_p13, %p821_p9 }
  0x33   : > { %829 = shalt.err (!%p826_p0)
}
  0x34   : > { %s830_s7 = scalar_lea.vmem %s1066_s22, 256  ;;  %s948_s10 = smov [#allocation2]  }
  0x35   : > { %p831_p1 = scmp.ne.s32.totalorder %s1066_s22, %s830_s7  ;;  %s835_s11 = sshll.u32 %s948_s10, 4  ;;  %s836_s11 = int_to_ptr.vmem [resolvable:$false] %s835_s11 }
  0x36   : > { %s837_s21 = scalar_lea.vmem %s836_s11, 512  ;;  %p838_p2 = scmp.lt.s32.totalorder %s1066_s22, %s836_s11 }
  0x37   : > { %p833_p6 = pnand %p831_p1, %p819_p7  ;;  %p839_p3 = scmp.lt.s32.totalorder %s837_s21, %s830_s7 }
  0x39   : > { %p834_p5 = pneg %p833_p6  ;;  %p840_p4 = por %p839_p3, %p838_p2 }
  0x3b   : > { %p841_p8 = pnand %p840_p4, %p834_p5 }
  0x3d   : > { %844 = shalt.err (!%p841_p8)
}
  0x3e   : > { %742 = dma.hbm_to_vmem [thread:$0]  (!%p1062_p11), %s1060_s17, 256, %s1066_s22, %s1068_s25, %s946_s28, %s946_s28, %s947_s29  }
  0x3f   : > { %p1215_p1 = scmp.ne.s32.totalorder %s1210_s20, 0 }
  0x40   : > { %s1095_s26 = sand.u32 (!%p1215_p1), 1, %s935_s13   ;;  %p1216_p4 = scmp.ne.s32.totalorder (!%p1215_p1), %s1208_s18, 0 }
  0x41   : > { %177 = sbr.rel (%p1215_p1) target bundleno = 350 (0x15e), region = 28  ;;  %s619_s27 = sshll.u32 (!%p1215_p1), %s1095_s26, 4 }
  0x42   : > { %s180_s30 = scalar_lea.sflag (!%p1215_p1), [#allocation3], %s1095_s26  ;;  %s1101_s23 = scalar_lea.vmem (!%p1215_p1), [#allocation2], %s619_s27 }
  0x46   : > { %914 = dma.done.wait (%p1216_p4), %s180_s30, 256  }
  0x47   : > { %916 = vsyncadd (%p1216_p4), %s180_s30, 4294967040  ;;  %p1217_p6 = scmp.eq.s32.totalorder %s994_s16, 0 }
  0x49   : > { %918 = dma.done.wait (%p1217_p6), [#allocation6], 6144   ;;  %p1218_p8 = pmov %p1217_p6 }
  0x4a   : > { %v277_v0 = vld [vmem:[#allocation5 + $0xf8] sm:$0xff]  ;;  %v276_v2 = vld [vmem:[#allocation5 + $0xf0] sm:$0xff]  ;;  %v275_v5 = vld [vmem:[#allocation5 + $0xe8] sm:$0xff]  ;;  %vm219_vm0 = vcmask 1040384   ;;  %vm230_vm1 = vcmask 1046528   ;;  %vm238_vm2 = vcmask 1045504  }
  0x4b   : > { %920 = vsyncadd (%p1218_p8), [#allocation6], 4294961152  ;;  %v261_v1 = vld [vmem:[#allocation5 + $0x78] sm:$0xff]  ;;  %634 = vmatprep.subr.mxu0 %v277_v0  ;;  %v260_v4 = vld [vmem:[#allocation5 + $0x70] sm:$0xff]  ;;  %s207_s18 = scalar_lea.vmem [#allocation7], %s619_s27  ;;  %s633_s28 = sshll.u32 %s994_s16, 8 }
  0x4c   : > { %v293_v3 = vld [vmem:[#allocation5 + $0x178] sm:$0xff]  ;;  %635 = vmatpush3.msra.mxu0 %v261_v1  ;;  %v292_v6 = vld [vmem:[#allocation5 + $0x170] sm:$0xff]  ;;  %v259_v7 = vld [vmem:[#allocation5 + $0x68] sm:$0xff]  ;;  %s483_s20 = sshll.u32 %s207_s18, 4  ;;  %s1132_s22 = scalar_lea.hbm %s1202_s2, %s633_s28  ;;  %s1127_s20 = int_to_ptr.vmem [resolvable:$true] %s483_s20 }
  0x4d   : > { %690 = vmatprep.subr.mxu1 %v293_v3  ;;  %636 = vmatprep.subr.mxu0 %v276_v2  ;;  %v291_v8 = vld [vmem:[#allocation5 + $0x168] sm:$0xff]  ;;  %v274_v9 = vld [vmem:[#allocation5 + $0xe0] sm:$0xff]  ;;  %v273_v12 = vld [vmem:[#allocation5 + $0xd8] sm:$0xff]  ;;  %s465_s25 = scalar_lea.sflag [#allocation4], %s1095_s26  ;;  %s845_s4 = scalar_lea.vmem %s1127_s20, 256 }
  0x4e   : > { %691 = vmatpush3.msra.mxu1 %v293_v3  ;;  %637 = vmatpush3.msra.mxu0 %v260_v4  ;;  %v258_v10 = vld [vmem:[#allocation5 + $0x60] sm:$0xff]  ;;  %v257_v13 = vld [vmem:[#allocation5 + $0x58] sm:$0xff]  ;;  %v272_v15 = vld [vmem:[#allocation5 + $0xd0] sm:$0xff]  ;;  %p846_p3 = scmp.ne.s32.totalorder %s1127_s20, %s845_s4  ;;  %p1219_p11 = scmp.ne.s32.totalorder %s1213_s6, 0 }
  0x4f   : > { %692 = vmatprep.subr.mxu1 %v292_v6  ;;  %638 = vmatprep.subr.mxu0 %v275_v5  ;;  %v290_v11 = vld [vmem:[#allocation5 + $0x160] sm:$0xff]  ;;  %v289_v14 = vld [vmem:[#allocation5 + $0x158] sm:$0xff]  ;;  %v256_v16 = vld [vmem:[#allocation5 + $0x50] sm:$0xff]  ;;  %s949_s8 = smov [#allocation7]  }
  0x50   : > { %693 = vmatpush3.msra.mxu1 %v292_v6  ;;  %639 = vmatpush3.msra.mxu0 %v259_v7  ;;  %v288_v17 = vld [vmem:[#allocation5 + $0x150] sm:$0xff]  ;;  %v271_v18 = vld [vmem:[#allocation5 + $0xc8] sm:$0xff]  ;;  %v270_v21 = vld [vmem:[#allocation5 + $0xc0] sm:$0xff]  ;;  %p847_p7 = pnand %p846_p3, %p1219_p11  ;;  %s849_s9 = sshll.u32 %s949_s8, 4  ;;  %s850_s9 = int_to_ptr.vmem [resolvable:$false] %s849_s9 }
  0x51   : > { %694 = vmatprep.subr.mxu1 %v291_v8  ;;  %640 = vmatprep.subr.mxu0 %v274_v9  ;;  %v255_v19 = vld [vmem:[#allocation5 + $0x48] sm:$0xff]  ;;  %v254_v22 = vld [vmem:[#allocation5 + $0x40] sm:$0xff]  ;;  %v269_v24 = vld [vmem:[#allocation5 + $0xb8] sm:$0xff]  ;;  %s851_s7 = scalar_lea.vmem %s850_s9, 512  ;;  %p852_p10 = scmp.lt.s32.totalorder %s1127_s20, %s850_s9 }
  0x52   : > { %695 = vmatpush3.msra.mxu1 %v291_v8  ;;  %641 = vmatpush3.msra.mxu0 %v258_v10  ;;  %v287_v20 = vld [vmem:[#allocation5 + $0x148] sm:$0xff]  ;;  %v286_v23 = vld [vmem:[#allocation5 + $0x140] sm:$0xff]  ;;  %v253_v25 = vld [vmem:[#allocation5 + $0x38] sm:$0xff]  ;;  %p848_p9 = pneg %p847_p7  ;;  %p853_p12 = scmp.lt.s32.totalorder %s851_s7, %s845_s4 }
  0x53   : > { %696 = vmatprep.subr.mxu1 %v290_v11  ;;  %642 = vmatprep.subr.mxu0 %v273_v12  ;;  %v285_v26 = vld [vmem:[#allocation5 + $0x138] sm:$0xff]  ;;  %v215_v27 = vld [vmem:[%s1101_s23] sm:$0xff]  ;;  %v267_v34 = vld [vmem:[#allocation5 + $0xa8] sm:$0xff] }
  0x54   : > { %697 = vmatpush3.msra.mxu1 %v290_v11  ;;  %643 = vmatpush3.msra.mxu0 %v257_v13  ;;  %v268_v28 = vld [vmem:[#allocation5 + $0xb0] sm:$0xff]  ;;  %v216_v29 = vld [vmem:[%s1101_s23 + $0x8] sm:$0xff]  ;;  %v1113_v32 = vrot.slane %v215_v27, 7  ;;  %v266_v37 = vld [vmem:[#allocation5 + $0xa0] sm:$0xff]  ;;  %p854_p13 = por %p853_p12, %p852_p10 }
  0x55   : > { %698 = vmatprep.subr.mxu1 %v289_v14  ;;  %644 = vmatprep.subr.mxu0 %v272_v15  ;;  %v252_v30 = vld [vmem:[#allocation5 + $0x30] sm:$0xff]  ;;  %v221_v33 = vrot.slane %v216_v29, 7  ;;  %v251_v35 = vld [vmem:[#allocation5 + $0x28] sm:$0xff]  ;;  %v250_v38 = vld [vmem:[#allocation5 + $0x20] sm:$0xff] }
  0x56   : > { %699 = vmatpush3.msra.mxu1 %v289_v14  ;;  %645 = vmatpush3.msra.mxu0 %v256_v16  ;;  %v284_v31 = vld [vmem:[#allocation5 + $0x130] sm:$0xff]  ;;  %v283_v36 = vld [vmem:[#allocation5 + $0x128] sm:$0xff]  ;;  %v282_v39 = vld [vmem:[#allocation5 + $0x120] sm:$0xff]  ;;  %v226_v41 = vsel %vm219_vm0, 0.0, %v1113_v32  ;;  %p855_p0 = pnand %p854_p13, %p848_p9 }
  0x57   : > { %700 = vmatprep.subr.mxu1 %v288_v17  ;;  %646 = vmatprep.subr.mxu0 %v271_v18  ;;  %v222_v40 = vsel %vm219_vm0, %v1113_v32, %v221_v33  ;;  %v265_v42 = vld [vmem:[#allocation5 + $0x98] sm:$0xff]  ;;  %v264_v45 = vld [vmem:[#allocation5 + $0x90] sm:$0xff]  ;;  %v231_v46 = vrot.slane %v226_v41, 1  ;;  %v227_v50 = vsel %vm219_vm0, %v221_v33, 0.0  ;;  %v263_v51 = vld [vmem:[#allocation5 + $0x88] sm:$0xff]  ;;  %v239_v54 = vrot.slane %v226_v41, 2 }
  0x58   : > { %701 = vmatpush3.msra.mxu1 %v288_v17  ;;  %647 = vmatpush3.msra.mxu0 %v255_v19  ;;  %v249_v43 = vld [vmem:[#allocation5 + $0x18] sm:$0xff]  ;;  %v232_v47 = vrot.slane %v222_v40, 1  ;;  %v248_v48 = vld [vmem:[#allocation5 + $0x10] sm:$0xff]  ;;  %v247_v52 = vld [vmem:[#allocation5 + $0x8] sm:$0xff]  ;;  %v240_v55 = vrot.slane %v222_v40, 2  ;;  %v242_v58 = vrot.slane %v227_v50, 2 }
  0x59   : > { %702 = vmatprep.subr.mxu1 %v287_v20  ;;  %648 = vmatprep.subr.mxu0 %v270_v21  ;;  %v281_v44 = vld [vmem:[#allocation5 + $0x118] sm:$0xff]  ;;  %v280_v49 = vld [vmem:[#allocation5 + $0x110] sm:$0xff]  ;;  %v279_v53 = vld [vmem:[#allocation5 + $0x108] sm:$0xff]  ;;  %v234_v59 = vrot.slane %v227_v50, 1 }
  0x5a   : > { %703 = vmatpush3.msra.mxu1 %v287_v20  ;;  %649 = vmatpush3.msra.mxu0 %v254_v22  ;;  %v262_v56 = vld [vmem:[#allocation5 + $0x80] sm:$0xff]  ;;  %v233_v57 = vsel %vm230_vm1, %v231_v46, %v232_v47  ;;  %vm623_vm3 = vmneg %vm219_vm0  ;;  %v241_v62 = vsel %vm238_vm2, %v239_v54, %v240_v55  ;;  %v243_v63 = vsel %vm238_vm2, %v240_v55, %v242_v58 }
  0x5b   : > { %704 = vmatprep.subr.mxu1 %v286_v23  ;;  %650 = vmatprep.subr.mxu0 %v269_v24  ;;  %v246_v60 = vld [vmem:[#allocation5] sm:$0xff]  ;;  %v235_v0 = vsel %vm230_vm1, %v232_v47, %v234_v59 }
  0x5c   : > { %705 = vmatpush3.msra.mxu1 %v286_v23  ;;  %651 = vmatpush3.msra.mxu0 %v253_v25  ;;  %v278_v61 = vld [vmem:[#allocation5 + $0x100] sm:$0xff] }
  0x5d   : > { %706 = vmatprep.subr.mxu1 %v285_v26  ;;  %652 = vmatprep.subr.mxu0 %v268_v28 }
  0x5e   : > { %707 = vmatpush3.msra.mxu1 %v285_v26  ;;  %653 = vmatpush3.msra.mxu0 %v252_v30 }
  0x5f   : > { %708 = vmatprep.subr.mxu1 %v284_v31  ;;  %654 = vmatprep.subr.mxu0 %v267_v34 }
  0x60   : > { %709 = vmatpush3.msra.mxu1 %v284_v31  ;;  %655 = vmatpush3.msra.mxu0 %v251_v35 }
  0x61   : > { %710 = vmatprep.subr.mxu1 %v283_v36  ;;  %656 = vmatprep.subr.mxu0 %v266_v37 }
  0x62   : > { %711 = vmatpush3.msra.mxu1 %v283_v36  ;;  %657 = vmatpush3.msra.mxu0 %v250_v38 }
  0x63   : > { %712 = vmatprep.subr.mxu1 %v282_v39  ;;  %658 = vmatprep.subr.mxu0 %v265_v42 }
  0x64   : > { %713 = vmatpush3.msra.mxu1 %v282_v39  ;;  %659 = vmatpush3.msra.mxu0 %v249_v43 }
  0x65   : > { %714 = vmatprep.subr.mxu1 %v281_v44  ;;  %660 = vmatprep.subr.mxu0 %v264_v45 }
  0x66   : > { %715 = vmatpush3.msra.mxu1 %v281_v44  ;;  %661 = vmatpush3.msra.mxu0 %v248_v48 }
  0x67   : > { %716 = vmatprep.subr.mxu1 %v280_v49  ;;  %662 = vmatprep.subr.mxu0 %v263_v51 }
  0x68   : > { %717 = vmatpush3.msra.mxu1 %v280_v49  ;;  %663 = vmatpush3.msra.mxu0 %v247_v52 }
  0x69   : > { %718 = vmatprep.subr.mxu1 %v279_v53  ;;  %664 = vmatprep.subr.mxu0 %v262_v56 }
  0x6a   : > { %358 = vmatprep.mubr.f32.mxu0 %v233_v57  ;;  %665 = vmatpush3.msra.mxu0 %v246_v60 }
  0x6b   : > { %719 = vmatpush3.msra.mxu1 %v279_v53  ;;  %624 = vmatmul.mubr.msk.f32.vlgmr.msra.gmra.mxu0 %vm623_vm3, %v1113_v32 }
  0x6c   : > { %720 = vmatprep.subr.mxu1 %v278_v61  ;;  %722 = vmatprep.mubr.f32.mxu1 %v241_v62 }
  0x6d   : > { %721 = vmatpush3.msra.mxu1 %v278_v61  ;;  %363 = vmatprep.mubr.f32.mxu0 %v235_v0 }
  0x6e   : > { %723 = vmatmul.mubr.f32.vlgmr.msra.gmra.mxu1 %v243_v63 }
  0x6f   : > { %364 = vmatmul.mubr.f32.gmra.mxu0 %v222_v40 }
 0x12b   : > { %v666_v1 = vpop.f32.mrf.mxu0 }
 0x12d   : > { %v667_v2 = vpop.f32.mrf.mxu0 }
 0x12e   : > { %v724_v3 = vpop.f32.mrf.mxu1  ;;  %v668_v4 = vadd.f32 %v667_v2, %v666_v1 }
 0x12f   : > { %v669_v5 = vpop.f32.mrf.mxu0 }
 0x130   : > { %v435_v6 = vpop.f32.mrf.mxu1 }
 0x131   : > { %v436_v7 = vadd.f32 %v668_v4, %v435_v6  ;;  %v670_v8 = vpop.f32.mrf.mxu0 }
 0x132   : > { %v671_v9 = vadd.f32 %v670_v8, %v669_v5 }
 0x133   : > { %444 = vst [vmem:[%s207_s18] sm:$0xff] %v436_v7  ;;  %v453_v11 = vmul.f32 %v436_v7, %v436_v7 }
 0x134   : > { %v441_v10 = vadd.f32 %v724_v3, %v671_v9 }
 0x136   : > { %445 = vst [vmem:[%s207_s18 + $0x8] sm:$0xff] %v441_v10  ;;  %v446_v12 = vadd.f32 %v441_v10, %v436_v7  ;;  %v454_v13 = vmul.f32 %v441_v10, %v441_v10 }
 0x137   : > { %858 = shalt.err (!%p855_p0)
}
 0x138   : > { %s859_s10 = scalar_lea.hbm %s1132_s22, 256  ;;  %s863_s27 = scalar_lea.hbm %s1202_s2, 512 }
 0x139   : > { %p860_p5 = scmp.ne.s32.totalorder %s1132_s22, %s859_s10  ;;  %p864_p4 = scmp.lt.s32.totalorder %s1132_s22, %s1202_s2 }
 0x13a   : > { %p865_p6 = scmp.lt.s32.totalorder %s863_s27, %s859_s10 }
 0x13b   : > { %p861_p2 = pnand %p860_p5, %p1219_p11 }
 0x13c   : > { %p866_p8 = por %p865_p6, %p864_p4 }
 0x13d   : > { %p862_p1 = pneg %p861_p2 }
 0x13f   : > { %p867_p3 = pnand %p866_p8, %p862_p1 }
 0x141   : > { %870 = shalt.err (!%p867_p3)
}
 0x142   : > { %s950_s18 = smov 128   ;;  %s951_s28 = smov 8   ;;  %v447_v14 = vrot.slane %v446_v12, 4  ;;  %v455_v15 = vadd.f32 %v454_v13, %v453_v11 }
 0x143   : > { %731 = dma.vmem_to_hbm [thread:$0]  (%p1219_p11), %s1127_s20, 256, %s1132_s22, %s465_s25, %s950_s18, %s950_s18, %s951_s28  }
 0x144   : > { %v448_v16 = vadd.f32 %v447_v14, %v446_v12  ;;  %v456_v17 = vrot.slane %v455_v15, 4  ;;  %s622_s29 = sshll.u32 %s1095_s26, 1  ;;  %s629_s17 = sshll.u32 %s994_s16, 5 }
 0x145   : > { %s214_s4 = scalar_lea.vmem [#allocation8], %s622_s29  ;;  %s1162_s25 = scalar_lea.hbm %s1203_s3, %s629_s17 }
 0x146   : > { %v449_v18 = vrot.slane %v448_v16, 2  ;;  %v457_v19 = vadd.f32 %v456_v17, %v455_v15  ;;  %s499_s8 = sshll.u32 %s214_s4, 4  ;;  %s470_s9 = scalar_lea.sflag [#allocation9], %s1095_s26  ;;  %s500_s8 = int_to_ptr.vmem [resolvable:$true] %s499_s8 }
 0x147   : > { %s871_s7 = scalar_lea.vmem %s500_s8, 32  ;;  %s952_s16 = smov [#allocation8]  }
 0x148   : > { %v450_v20 = vadd.f32 %v449_v18, %v448_v16  ;;  %v458_v21 = vrot.slane %v457_v19, 2  ;;  %p872_p7 = scmp.ne.s32.totalorder %s500_s8, %s871_s7  ;;  %s875_s10 = sshll.u32 %s952_s16, 4  ;;  %s876_s10 = int_to_ptr.vmem [resolvable:$false] %s875_s10 }
 0x149   : > { %s877_s11 = scalar_lea.vmem %s876_s10, 64  ;;  %p878_p12 = scmp.lt.s32.totalorder %s500_s8, %s876_s10 }
 0x14a   : > { %v451_v22 = vrot.slane %v450_v20, 1  ;;  %v459_v23 = vadd.f32 %v458_v21, %v457_v19  ;;  %p873_p9 = pnand %p872_p7, %p1219_p11  ;;  %p879_p13 = scmp.lt.s32.totalorder %s877_s11, %s871_s7 }
 0x14c   : > { %v460_v24 = vrot.slane %v459_v23, 1  ;;  %v452_v25 = vadd.f32 %v451_v22, %v450_v20  ;;  %p874_p10 = pneg %p873_p9  ;;  %p880_p0 = por %p879_p13, %p878_p12 }
 0x14e   : > { %v461_v26 = vadd.f32 %v460_v24, %v459_v23  ;;  %p881_p5 = pnand %p880_p0, %p874_p10 }
 0x150   : > { %v462_v27 = vsel %vm219_vm0, %v452_v25, %v461_v26 }
 0x151   : > { %463 = vst [vmem:[%s214_s4] sm:$0x3] %v462_v27 }
 0x152   : > { %884 = shalt.err (!%p881_p5)
}
 0x153   : > { %s885_s21 = scalar_lea.hbm %s1162_s25, 32  ;;  %s889_s30 = scalar_lea.hbm %s1203_s3, 64 }
 0x154   : > { %p886_p2 = scmp.ne.s32.totalorder %s1162_s25, %s885_s21  ;;  %p890_p6 = scmp.lt.s32.totalorder %s1162_s25, %s1203_s3 }
 0x155   : > { %p891_p8 = scmp.lt.s32.totalorder %s889_s30, %s885_s21 }
 0x156   : > { %p887_p1 = pnand %p886_p2, %p1219_p11 }
 0x157   : > { %p892_p3 = por %p891_p8, %p890_p6 }
 0x158   : > { %p888_p4 = pneg %p887_p1 }
 0x15a   : > { %p893_p7 = pnand %p892_p3, %p888_p4 }
 0x15c   : > { %896 = shalt.err (!%p893_p7)
}
 0x15d   : > { %732 = dma.vmem_to_hbm [thread:$0]  (%p1219_p11), %s500_s8, 32, %s1162_s25, %s470_s9  }
 0x15e PF: > { %s511_s28 = sand.u32 1, %s931_s12   ;;  %p1220_p9 = scmp.ne.s32.totalorder %s1209_s19, 0 }
 0x15f   : > { %p1221_p10 = scmp.ge.s32.totalorder %s943_s15, 2  ;;  %s512_s29 = scalar_lea.sflag [#allocation4], %s511_s28 }
 0x161   : > { %p744_p12 = pnand %p1221_p10, %p1220_p9 }
 0x163   : > { %p745_p13 = pneg %p744_p12 }
 0x165   : > { %922 = dma.done.wait (%p745_p13), %s512_s29, 256  }
 0x166   : > { %924 = vsyncadd (%p745_p13), %s512_s29, 4294967040  ;;  %s521_s17 = scalar_lea.sflag [#allocation9], %s511_s28 }
 0x167   : > { %926 = dma.done.wait (%p745_p13), %s521_s17, 32  }
 0x168   : > { %928 = vsyncadd (%p745_p13), %s521_s17, 4294967264  ;;  %p21_p11 = scmp.ge.s32.totalorder %s1027_s24, 4   ;;  %s1222_s12 = smov %s935_s13 }
 0x169   : > { %s1223_s13 = smov %s939_s14  ;;  %s1224_s14 = smov %s1047_s5 }
 0x16a   : > { %s1225_s15 = smov %s1027_s24  ;;  %23 = sbr.rel (!%p21_p11) target bundleno = 8 (0x8), region = 94 }
 0x16f   :  { %526 = vsyncpa [#allocation3], 1 }
 0x170   :  { %528 = vsyncpa [#allocation3 + $0x1], 1 }
 0x171   :  { %529 = vsyncpa [#allocation6], 1 }
 0x172   :  { %530 = vsyncpa [#allocation4], 1 }
 0x173   :  { %532 = vsyncpa [#allocation4 + $0x1], 1 }
 0x174   :  { %533 = vsyncpa [#allocation9], 1 }
 0x175   :  { %535 = vsyncpa [#allocation9 + $0x1], 1 }

</bundles_post_ra>
